<compile_context>
chip_gen: v7x
topology: tpu7x:2x2x1
jax: 0.10.0
libtpu: 0.0.40
codegen_flags: <defaults>
</compile_context>

<pallas_src>
import functools

import jax
import jax.numpy as jnp
from jax.experimental import pallas as pl
from jax.experimental.pallas import tpu as pltpu

HIDDEN = 32                      # logical hidden width of the MLP
HIDDEN_PAD = 128                 # hidden padded to a full lane group
MAX_TILE_ROWS = 2048             # upper cap on batch-tile rows
_DEFAULT_VMEM_CAP = 64 * 1024 * 1024   # v7x worst case (per TensorCore)


def _cdiv(a, b):
    return -(-a // b)


def _round_up(x, m):
    return ((x + m - 1) // m) * m


def _mlp_kernel(x_ref, w1_ref, b1_ref, w2_ref, b2_ref, o_ref):
    # Layer 1: x @ W1p + b1p   (hidden padded to 128 lanes; pad cols are zero)
    h = jnp.dot(x_ref[...], w1_ref[...], preferred_element_type=jnp.float32)
    h = jnp.maximum(h + b1_ref[...], jnp.float32(0.0))      # ReLU
    # Layer 2: h @ W2p + b2p   (output kept at its logical width)
    y = jnp.dot(h, w2_ref[...], preferred_element_type=jnp.float32)
    o_ref[...] = (y + b2_ref[...]).astype(o_ref.dtype)


def pack_params(w1, b1, w2, b2):
    """One-time repack from PyTorch nn.Linear layout to kernel layout.

    w1 : (32, in_size), b1 : (32,), w2 : (out_size, 32), b2 : (out_size,)
    returns
      w1p : (in_size, 128)     transposed, zero-padded hidden columns
      b1p : (1, 128)
      w2p : (128, out_size)    transposed, zero-padded hidden rows
      b2p : (1, out_size)
    """
    in_size = w1.shape[1]
    out_size = w2.shape[0]
    w1p = jnp.zeros((in_size, HIDDEN_PAD), jnp.float32).at[:, :HIDDEN].set(w1.T)
    b1p = jnp.zeros((1, HIDDEN_PAD), jnp.float32).at[0, :HIDDEN].set(b1)
    w2p = jnp.zeros((HIDDEN_PAD, out_size), jnp.float32).at[:HIDDEN, :].set(w2.T)
    b2p = b2.reshape(1, out_size).astype(jnp.float32)
    return w1p, b1p, w2p, b2p


def _plan_tiles(n, in_size, out_size):
    """Pick batch-tile rows + VMEM limit from hardware capacity and shapes."""
    try:
        vmem_cap = int(pltpu.get_tpu_info().vmem_capacity_bytes)
    except Exception:
        vmem_cap = _DEFAULT_VMEM_CAP
    budget = vmem_cap // 2                       # headroom for compiler scratch

    # Double-buffered streamed x/out tiles + double-buffered resident params.
    bytes_per_row = (in_size + out_size) * 4 * 2
    weight_bytes = 4 * 2 * ((in_size + 1) * HIDDEN_PAD + (HIDDEN_PAD + 1) * out_size)
    avail = max(budget - weight_bytes, bytes_per_row * 8)
    max_rows = max(8, min(MAX_TILE_ROWS, (avail // bytes_per_row) // 8 * 8))

    # Balance tiles so ragged batches pad < 8 rows/tile; >= 2 steps for v7x TCs.
    num_tiles = _cdiv(n, max_rows)
    if n >= 64:
        num_tiles = max(num_tiles, 2)
    tn = min(max_rows, _round_up(_cdiv(n, num_tiles), 8))

    needed = tn * bytes_per_row + weight_bytes
    vmem_limit = int(min(vmem_cap, max(needed * 2, 32 * 1024 * 1024)))
    return tn, vmem_limit


@functools.partial(jax.jit, static_argnames=("tn", "vmem_limit_bytes"))
def _forward(x, w1p, b1p, w2p, b2p, *, tn, vmem_limit_bytes):
    n, in_size = x.shape
    hidden_pad = w1p.shape[1]
    out_size = w2p.shape[1]
    grid = (_cdiv(n, tn),)       # ragged final block handled by Pallas (clipped)

    cost = pl.CostEstimate(
        flops=2 * n * (in_size * hidden_pad + hidden_pad * out_size),
        transcendentals=0,
        bytes_accessed=4 * (n * (in_size + out_size)
                            + (in_size + 1) * hidden_pad
                            + (hidden_pad + 1) * out_size),
    )

    return pl.pallas_call(
        _mlp_kernel,
        out_shape=jax.ShapeDtypeStruct((n, out_size), x.dtype),
        grid=grid,
        in_specs=[
            pl.BlockSpec((tn, in_size), lambda i: (i, 0)),          # x streams
            pl.BlockSpec((in_size, hidden_pad), lambda i: (0, 0)),  # W1 resident
            pl.BlockSpec((1, hidden_pad), lambda i: (0, 0)),        # b1 resident
            pl.BlockSpec((hidden_pad, out_size), lambda i: (0, 0)), # W2 resident
            pl.BlockSpec((1, out_size), lambda i: (0, 0)),          # b2 resident
        ],
        out_specs=pl.BlockSpec((tn, out_size), lambda i: (i, 0)),   # logical width
        compiler_params=pltpu.CompilerParams(
            dimension_semantics=("parallel",),
            vmem_limit_bytes=vmem_limit_bytes,
        ),
        cost_estimate=cost,
    )(x, w1p, b1p, w2p, b2p)


def neuralnet_forward(x, w1p, b1p, w2p, b2p):
    """Forward pass of the in_size -> 32 -> out_size MLP.

    x : (N, in_size) float32, params in kernel layout (see pack_params).
    returns (N, out_size) float32
    """
    n, in_size = x.shape
    out_size = w2p.shape[1]
    tn, vmem_limit = _plan_tiles(n, in_size, out_size)
    return _forward(x, w1p, b1p, w2p, b2p, tn=tn, vmem_limit_bytes=vmem_limit)


def init_params(key, in_size, out_size):
    """Deterministic init matching PyTorch nn.Linear default:
    U(-1/sqrt(fan_in), 1/sqrt(fan_in)) for both weight and bias."""
    k1, k2, k3, k4 = jax.random.split(key, 4)
    bound1 = 1.0 / jnp.sqrt(in_size)
    bound2 = 1.0 / jnp.sqrt(HIDDEN)
    w1 = jax.random.uniform(k1, (HIDDEN, in_size), jnp.float32, -bound1, bound1)
    b1 = jax.random.uniform(k2, (HIDDEN,), jnp.float32, -bound1, bound1)
    w2 = jax.random.uniform(k3, (out_size, HIDDEN), jnp.float32, -bound2, bound2)
    b2 = jax.random.uniform(k4, (out_size,), jnp.float32, -bound2, bound2)
    return w1, b1, w2, b2


if __name__ == "__main__":
    key = jax.random.PRNGKey(0)
    N, IN_SIZE, OUT_SIZE = 8, 64, 4

    kx, kp = jax.random.split(key)
    x = jax.random.normal(kx, (N, IN_SIZE), jnp.float32)
    w1, b1, w2, b2 = init_params(kp, IN_SIZE, OUT_SIZE)

    # One-time layout glue (hoisted out of the hot path).
    w1p, b1p, w2p, b2p = pack_params(w1, b1, w2, b2)

    y = jax.block_until_ready(neuralnet_forward(x, w1p, b1p, w2p, b2p))

    # Reference check in plain JAX (same math as the torch nn.Sequential forward).
    y_ref = jnp.maximum(x @ w1.T + b1, 0.0) @ w2.T + b2
    assert y.shape == (N, OUT_SIZE)
    assert jnp.allclose(y, y_ref, atol=1e-5, rtol=1e-5)

    # Larger ragged batch: multi-tile grid (>= 2 steps) + clipped final block.
    N2 = 1000
    x2 = jax.random.normal(jax.random.PRNGKey(1), (N2, IN_SIZE), jnp.float32)
    y2 = jax.block_until_ready(neuralnet_forward(x2, w1p, b1p, w2p, b2p))
    y2_ref = jnp.maximum(x2 @ w1.T + b1, 0.0) @ w2.T + b2
    assert y2.shape == (N2, OUT_SIZE)
    assert jnp.allclose(y2, y2_ref, atol=1e-4, rtol=1e-4)

    # Tiny non-multiple-of-8 batch: single partial block, clipped writeback.
    N3 = 10
    x3 = jax.random.normal(jax.random.PRNGKey(2), (N3, IN_SIZE), jnp.float32)
    y3 = jax.block_until_ready(neuralnet_forward(x3, w1p, b1p, w2p, b2p))
    y3_ref = jnp.maximum(x3 @ w1.T + b1, 0.0) @ w2.T + b2
    assert y3.shape == (N3, OUT_SIZE)
    assert jnp.allclose(y3, y3_ref, atol=1e-5, rtol=1e-5)

    print("KERNEL_OK")
</pallas_src>

<mosaic_0001>
module attributes {stable_mosaic.version = 11 : i64} {
  func.func @_mlp_kernel(%arg0: i32, %arg1: memref<8x64xf32, #tpu.memory_space<vmem>>, %arg2: memref<64x128xf32, #tpu.memory_space<vmem>>, %arg3: memref<1x128xf32, #tpu.memory_space<vmem>>, %arg4: memref<128x4xf32, #tpu.memory_space<vmem>>, %arg5: memref<1x4xf32, #tpu.memory_space<vmem>>, %arg6: memref<8x4xf32, #tpu.memory_space<vmem>>) attributes {dimension_semantics = [#tpu.dimension_semantics<parallel>], iteration_bounds = array<i64: 1>, scalar_prefetch = 0 : i64, scratch_operands = 0 : i64, tpu.core_type = #tpu.core_type<tc>, window_params = [{transform_indices = @transform_0, window_bounds = array<i64: 8, 64>}, {pipeline_mode = #tpu.pipeline_mode<synchronous>, transform_indices = @transform_1, window_bounds = array<i64: 64, 128>}, {pipeline_mode = #tpu.pipeline_mode<synchronous>, transform_indices = @transform_2, window_bounds = array<i64: 1, 128>}, {pipeline_mode = #tpu.pipeline_mode<synchronous>, transform_indices = @transform_3, window_bounds = array<i64: 128, 4>}, {pipeline_mode = #tpu.pipeline_mode<synchronous>, transform_indices = @transform_4, window_bounds = array<i64: 1, 4>}, {transform_indices = @transform_5, window_bounds = array<i64: 8, 4>}]} {
    %c0 = arith.constant 0 : index
    %c0_0 = arith.constant 0 : index
    %0 = vector.load %arg1[%c0, %c0_0] : memref<8x64xf32, #tpu.memory_space<vmem>>, vector<8x64xf32>
    %c0_1 = arith.constant 0 : index
    %c0_2 = arith.constant 0 : index
    %1 = vector.load %arg2[%c0_1, %c0_2] : memref<64x128xf32, #tpu.memory_space<vmem>>, vector<64x128xf32>
    %cst = arith.constant dense<0.000000e+00> : vector<8x128xf32>
    %2 = tpu.matmul %0, %1, %cst {dimension_numbers = #tpu.dot_dimension_numbers<[1], [0], [0], [1], [0, 0, 1, 1], [], []>} : vector<8x64xf32>, vector<64x128xf32>, vector<8x128xf32> -> vector<8x128xf32>
    %c0_3 = arith.constant 0 : index
    %c0_4 = arith.constant 0 : index
    %3 = vector.load %arg3[%c0_3, %c0_4] : memref<1x128xf32, #tpu.memory_space<vmem>>, vector<1x128xf32>
    %4 = vector.broadcast %3 : vector<1x128xf32> to vector<8x128xf32>
    %5 = arith.addf %2, %4 : vector<8x128xf32>
    %cst_5 = arith.constant 0.000000e+00 : f32
    %6 = vector.broadcast %cst_5 : f32 to vector<8x128xf32>
    %7 = arith.maximumf %5, %6 : vector<8x128xf32>
    %c0_6 = arith.constant 0 : index
    %c0_7 = arith.constant 0 : index
    %8 = vector.load %arg4[%c0_6, %c0_7] : memref<128x4xf32, #tpu.memory_space<vmem>>, vector<128x4xf32>
    %cst_8 = arith.constant dense<0.000000e+00> : vector<8x4xf32>
    %9 = tpu.matmul %7, %8, %cst_8 {dimension_numbers = #tpu.dot_dimension_numbers<[1], [0], [0], [1], [0, 0, 1, 1], [], []>} : vector<8x128xf32>, vector<128x4xf32>, vector<8x4xf32> -> vector<8x4xf32>
    %c0_9 = arith.constant 0 : index
    %c0_10 = arith.constant 0 : index
    %10 = vector.load %arg5[%c0_9, %c0_10] : memref<1x4xf32, #tpu.memory_space<vmem>>, vector<1x4xf32>
    %11 = vector.broadcast %10 : vector<1x4xf32> to vector<8x4xf32>
    %12 = arith.addf %9, %11 : vector<8x4xf32>
    %c0_11 = arith.constant 0 : index
    %c0_12 = arith.constant 0 : index
    %13 = vector.load %arg6[%c0_11, %c0_12] : memref<8x4xf32, #tpu.memory_space<vmem>>, vector<8x4xf32>
    tpu.vector_store %arg6[%c0_11, %c0_12], %12 {strides = array<i32>} : memref<8x4xf32, #tpu.memory_space<vmem>>, vector<8x4xf32>,
    return
  }
  func.func @transform_0(%arg0: i32) -> (i32, i32) {
    %c0_i32 = arith.constant 0 : i32
    %c0_i32_0 = arith.constant 0 : i32
    return %arg0, %c0_i32 : i32, i32
  }
  func.func @transform_1(%arg0: i32) -> (i32, i32) {
    %c0_i32 = arith.constant 0 : i32
    %c0_i32_0 = arith.constant 0 : i32
    %c0_i32_1 = arith.constant 0 : i32
    return %c0_i32, %c0_i32_0 : i32, i32
  }
  func.func @transform_2(%arg0: i32) -> (i32, i32) {
    %c0_i32 = arith.constant 0 : i32
    %c0_i32_0 = arith.constant 0 : i32
    %c0_i32_1 = arith.constant 0 : i32
    return %c0_i32, %c0_i32_0 : i32, i32
  }
  func.func @transform_3(%arg0: i32) -> (i32, i32) {
    %c0_i32 = arith.constant 0 : i32
    %c0_i32_0 = arith.constant 0 : i32
    %c0_i32_1 = arith.constant 0 : i32
    return %c0_i32, %c0_i32_0 : i32, i32
  }
  func.func @transform_4(%arg0: i32) -> (i32, i32) {
    %c0_i32 = arith.constant 0 : i32
    %c0_i32_0 = arith.constant 0 : i32
    %c0_i32_1 = arith.constant 0 : i32
    return %c0_i32, %c0_i32_0 : i32, i32
  }
  func.func @transform_5(%arg0: i32) -> (i32, i32) {
    %c0_i32 = arith.constant 0 : i32
    %c0_i32_0 = arith.constant 0 : i32
    return %arg0, %c0_i32 : i32, i32
  }
}

</mosaic_0001>

<bundles_post_ra>
// kernel: _forward.1
= control target key start
LH: loop header
LB: loop body
LE: loop exit
PB: predicated region body
PF: predicated region fallthrough
CT: control target
= control target key end

     0   :  { %v332_v0 = vmov 0.0|0.0   ;;  %vm333_vm0 = vmmov 0   ;;  %v334_v4 = vmov 0.0   ;;  %vm36_vm1 = vcmask 523264   ;;  %s461_s1 = inlined_call_operand.vmem [shape: f32[64,128], index: 1, kind: input, shape index: {}]   ;;  %s462_s3 = inlined_call_operand.vmem [shape: f32[128,4], index: 3, kind: input, shape index: {}]   ;;  %s463_s0 = inlined_call_operand.vmem [shape: f32[8,64], index: 0, kind: input, shape index: {}]   ;;  %s464_s2 = inlined_call_operand.vmem [shape: f32[1,128], index: 2, kind: input, shape index: {}]   ;;  %s465_s4 = inlined_call_operand.vmem [shape: f32[1,4], index: 4, kind: input, shape index: {}]   ;;  %s466_s5 = inlined_call_operand.vmem [shape: f32[8,4], index: 5, kind: output, shape index: {}]  }
   0x1   :  { %293 = vmatprep.subr.bf16.mxu0 %v332_v0  ;;  %v21_v1 = vld [vmem:[%s461_s1] sm:$0xff]  ;;  %v22_v2 = vld [vmem:[%s461_s1 + $0x8] sm:$0xff]  ;;  %v23_v3 = vld [vmem:[%s461_s1 + $0x10] sm:$0xff]  ;;  %255 = vmatprep.mubr.msk.f32.mxu0 %vm333_vm0, %v334_v4  ;;  %vm204_vm2 = vcmask 31744  }
   0x2   :  { %v294_v5 = vpack.c.bf16 %v22_v2, %v21_v1  ;;  %v24_v6 = vld [vmem:[%s461_s1 + $0x18] sm:$0xff]  ;;  %305 = vmatprep.subr.bf16.mxu1 %v332_v0  ;;  %290 = vmatprep.mubr.msk.f32.mxu1 %vm333_vm0, %v334_v4  ;;  %v111_v8 = vld [vmem:[%s462_s3] sm:$0xff]  ;;  %v112_v9 = vld [vmem:[%s462_s3 + $0x8] sm:$0xff] }
   0x3   :  { %v297_v7 = vpack.c.bf16 %v24_v6, %v23_v3  ;;  %v113_v10 = vld [vmem:[%s462_s3 + $0x10] sm:$0xff]  ;;  %v25_v11 = vld [vmem:[%s461_s1 + $0x20] sm:$0xff]  ;;  %v26_v12 = vld [vmem:[%s461_s1 + $0x28] sm:$0xff]  ;;  %v306_v13 = vpack.c.bf16 %v112_v9, %v111_v8 }
   0x4   :  { %295 = vmatpush3.bf16.msra.mxu0 %v294_v5  ;;  %v114_v14 = vld [vmem:[%s462_s3 + $0x18] sm:$0xff]  ;;  %v300_v16 = vpack.c.bf16 %v26_v12, %v25_v11  ;;  %v115_v17 = vld [vmem:[%s462_s3 + $0x20] sm:$0xff]  ;;  %v116_v18 = vld [vmem:[%s462_s3 + $0x28] sm:$0xff] }
   0x5   :  { %296 = vmatprep.subr.bf16.mxu0 %v332_v0  ;;  %307 = vmatpush3.bf16.msra.mxu1 %v306_v13  ;;  %v309_v15 = vpack.c.bf16 %v114_v14, %v113_v10  ;;  %v27_v19 = vld [vmem:[%s461_s1 + $0x30] sm:$0xff]  ;;  %v28_v20 = vld [vmem:[%s461_s1 + $0x38] sm:$0xff]  ;;  %v312_v21 = vpack.c.bf16 %v116_v18, %v115_v17  ;;  %v20_v26 = vld [vmem:[%s463_s0] sm:$0xff] }
   0x6   :  { %308 = vmatprep.subr.bf16.mxu1 %v332_v0  ;;  %v303_v22 = vpack.c.bf16 %v28_v20, %v27_v19  ;;  %v117_v23 = vld [vmem:[%s462_s3 + $0x30] sm:$0xff]  ;;  %v118_v24 = vld [vmem:[%s462_s3 + $0x38] sm:$0xff]  ;;  %v119_v27 = vld [vmem:[%s462_s3 + $0x40] sm:$0xff] }
   0x7   :  { %v315_v25 = vpack.c.bf16 %v118_v24, %v117_v23  ;;  %v120_v28 = vld [vmem:[%s462_s3 + $0x48] sm:$0xff]  ;;  %v121_v30 = vld [vmem:[%s462_s3 + $0x50] sm:$0xff]  ;;  %v122_v31 = vld [vmem:[%s462_s3 + $0x58] sm:$0xff] }
   0x8   :  { %298 = vmatpush3.bf16.msra.mxu0 %v297_v7  ;;  %v318_v29 = vpack.c.bf16 %v120_v28, %v119_v27  ;;  %v321_v32 = vpack.c.bf16 %v122_v31, %v121_v30  ;;  %v123_v33 = vld [vmem:[%s462_s3 + $0x60] sm:$0xff]  ;;  %v124_v34 = vld [vmem:[%s462_s3 + $0x68] sm:$0xff]  ;;  %v125_v36 = vld [vmem:[%s462_s3 + $0x70] sm:$0xff] }
   0x9   :  { %299 = vmatprep.subr.bf16.mxu0 %v332_v0  ;;  %310 = vmatpush3.bf16.msra.mxu1 %v309_v15  ;;  %v324_v35 = vpack.c.bf16 %v124_v34, %v123_v33  ;;  %v126_v37 = vld [vmem:[%s462_s3 + $0x78] sm:$0xff]  ;;  %v210_v39 = vld [vmem:[%s464_s2] ss:$0 sm:$0xff] }
   0xa   :  { %311 = vmatprep.subr.bf16.mxu1 %v332_v0  ;;  %v327_v38 = vpack.c.bf16 %v126_v37, %v125_v36  ;;  %v212_v44 = vld [vmem:[%s465_s4] ss:$0 sm:$0xff] }
   0xc   :  { %301 = vmatpush3.bf16.msra.mxu0 %v300_v16 }
   0xd   :  { %302 = vmatprep.subr.bf16.mxu0 %v332_v0  ;;  %313 = vmatpush3.bf16.msra.mxu1 %v312_v21 }
   0xe   :  { %314 = vmatprep.subr.bf16.mxu1 %v332_v0 }
  0x10   :  { %304 = vmatpush3.bf16.msra.mxu0 %v303_v22 }
  0x11   :  { %316 = vmatpush3.bf16.msra.mxu1 %v315_v25 }
  0x12   :  { %317 = vmatprep.subr.bf16.mxu1 %v332_v0 }
  0x13   :  { %256 = vmatmul.mubr.msk.f32.vlgmr.msra.gmra.mrb[0].mxu0 %vm36_vm1, %v20_v26 }
  0x15   :  { %319 = vmatpush3.bf16.msra.mxu1 %v318_v29 }
  0x16   :  { %320 = vmatprep.subr.bf16.mxu1 %v332_v0 }
  0x19   :  { %322 = vmatpush3.bf16.msra.mxu1 %v321_v32 }
  0x1a   :  { %323 = vmatprep.subr.bf16.mxu1 %v332_v0 }
  0x1d   :  { %325 = vmatpush3.bf16.msra.mxu1 %v324_v35 }
  0x1e   :  { %326 = vmatprep.subr.bf16.mxu1 %v332_v0 }
  0x21   :  { %328 = vmatpush3.bf16.msra.mxu1 %v327_v38 }
  0xe6   :  { %v106_v40 = vpop.f32.mrb[0].mxu0 }
  0xe7   :  { %v107_v41 = vadd.f32 %v210_v39, %v106_v40  ;;  %v257_v42 = vpop.f32.mrb[1].mxu0 }
  0xe9   :  { %v110_v43 = vmax.f32 %v107_v41, 0.0 }
  0xeb   :  { %291 = vmatmul.mubr.f32.vlgmr.msra.gmra.mrb[0].mxu1 %v110_v43 }
 0x1be   :  { %v200_v45 = vpop.f32.mrb[0].mxu1 }
 0x1bf   :  { %v201_v46 = vadd.f32 %v212_v44, %v200_v45  ;;  %v292_v47 = vpop.f32.mrb[1].mxu1 }
 0x1c1   :  { %205 = vst.msk [vmem:[%s466_s5] sm:$0xff] %vm204_vm2, %v201_v46 }

</bundles_post_ra>
